<compile_context>
chip_gen: v7x
topology: tpu7x:2x2x1
jax: 0.10.0
libtpu: 0.0.40
codegen_flags: <defaults>
</compile_context>

<pallas_src>
import jax
import jax.numpy as jnp
from jax import lax
from jax.experimental import pallas as pl
from jax.experimental.pallas import tpu as pltpu


# ------------------------------- helpers -------------------------------------
def _round_up(x, m):
    return (x + m - 1) // m * m


def _pad2(a, rows, cols):
    return jnp.pad(a, ((0, rows - a.shape[0]), (0, cols - a.shape[1])))


# ----------------------------- Pallas kernel ---------------------------------
def categorical_nn_kernel(idx_ref, we_ref, w1_ref, b1_ref, w2_ref, b2_ref,
                          w3_ref, b3_ref, out_ref):
    # idx_ref: int32 [TB, NV]  -- row index into the block-diagonal combined
    #                             embedding matrix, -1 for missing / pad rows.
    # we_ref : bf16 [C_pad, E_pad]  -- block-diagonal concat of all tables.
    # w*_ref : bf16 [in_pad, out_pad],  b*_ref: f32 [1, out_pad].
    idx = idx_ref[...]
    tb = idx.shape[0]
    c_pad = we_ref.shape[0]

    # In-kernel "gather": each variable owns a disjoint block of columns in the
    # combined one-hot, so summing the per-variable one-hots and doing a single
    # MXU matmul against the block-diagonal table yields the concatenated,
    # missing-masked embedding row.
    col = lax.broadcasted_iota(jnp.int32, (tb, c_pad), 1)
    oh = jnp.zeros((tb, c_pad), jnp.float32)
    for i in range(idx.shape[1]):                       # static, small (num_vars)
        oh = oh + (col == idx[:, i:i + 1]).astype(jnp.float32)

    x = jnp.dot(oh.astype(jnp.bfloat16), we_ref[...],
                preferred_element_type=jnp.float32)      # [TB, E_pad] f32 (exact)

    h1 = jnp.dot(x.astype(jnp.bfloat16), w1_ref[...],
                 preferred_element_type=jnp.float32)
    h1 = jnp.maximum(h1 + b1_ref[...], 0.0)              # f32 ReLU

    h2 = jnp.dot(h1.astype(jnp.bfloat16), w2_ref[...],
                 preferred_element_type=jnp.float32)
    h2 = jnp.maximum(h2 + b2_ref[...], 0.0)              # f32 ReLU

    y = jnp.dot(h2.astype(jnp.bfloat16), w3_ref[...],
                preferred_element_type=jnp.float32)
    out_ref[...] = y + b3_ref[...]                        # f32 logits


# ------------------------------- wrapper --------------------------------------
def categorical_nn_forward(x_idx, params, *, tb_max=512):
    """x_idx: int32 [B, num_vars].  Returns f32 [B, output_dim]."""
    emb_tables = params["embeddings"]          # list of [num_cat_i, emb_dim_i]
    w1, b1 = params["w1"], params["b1"]        # [E, H], [1, H]
    w2, b2 = params["w2"], params["b2"]        # [H, H], [1, H]
    w3, b3 = params["w3"], params["b3"]        # [H, O], [1, O]

    B, NV = x_idx.shape
    num_cats = [int(t.shape[0]) for t in emb_tables]
    emb_dims = [int(t.shape[1]) for t in emb_tables]
    C = sum(num_cats)
    E = sum(emb_dims)
    H = w1.shape[1]
    O = w3.shape[1]

    # ---- lane/sublane-friendly padded feature dims ---------------------------
    C_pad = _round_up(C, 128)
    E_pad = _round_up(E, 128)
    H_pad = _round_up(H, 128)
    O_pad = _round_up(O, 128)

    # ---- batch tiling: multiple-of-16 tiles, minimal padding, >= 2 tiles -----
    n_tiles = max(2, pl.cdiv(B, tb_max))
    TB = _round_up(pl.cdiv(B, n_tiles), 16)
    B_pad = n_tiles * TB

    # ---- glue (plain JAX, cheap): build block-diagonal table + global indices
    w_emb = jnp.zeros((C_pad, E_pad), jnp.float32)
    idx_cols = []
    row_off = 0
    col_off = 0
    for i, table in enumerate(emb_tables):
        nc, ed = table.shape
        w_emb = w_emb.at[row_off:row_off + nc, col_off:col_off + ed].set(table)
        idx_i = x_idx[:, i].astype(jnp.int32)
        # missing index (0) -> -1 so the in-kernel one-hot row is all-zero
        idx_cols.append(jnp.where(idx_i != 0, idx_i + row_off, -1))
        row_off += nc
        col_off += ed
    idx_g = jnp.stack(idx_cols, axis=1)                             # [B, NV]
    idx_g = jnp.pad(idx_g, ((0, B_pad - B), (0, 0)), constant_values=-1)

    w_emb = w_emb.astype(jnp.bfloat16)
    w1_p = _pad2(w1, E_pad, H_pad).astype(jnp.bfloat16)
    w2_p = _pad2(w2, H_pad, H_pad).astype(jnp.bfloat16)
    w3_p = _pad2(w3, H_pad, O_pad).astype(jnp.bfloat16)
    b1_p = _pad2(b1, 1, H_pad)                                      # f32
    b2_p = _pad2(b2, 1, H_pad)
    b3_p = _pad2(b3, 1, O_pad)

    # ---- cost estimate --------------------------------------------------------
    w_bytes = 2 * (C_pad * E_pad + E_pad * H_pad + H_pad * H_pad + H_pad * O_pad)
    b_bytes = 4 * (2 * H_pad + O_pad)
    flops = 2 * B_pad * (C_pad * E_pad + E_pad * H_pad
                         + H_pad * H_pad + H_pad * O_pad)
    bytes_accessed = B_pad * NV * 4 + B_pad * O_pad * 4 + w_bytes + b_bytes
    cost = pl.CostEstimate(flops=flops, transcendentals=0,
                           bytes_accessed=bytes_accessed)

    # ---- explicit VMEM budget (v5e default 16 MiB is too small for big H;
    #      cap at 48 MiB so it stays safe on v7x's 64 MiB physical VMEM) -------
    tile_bytes = TB * 128 * 4 + TB * O_pad * 4           # idx (lane-padded) + out
    interm_bytes = TB * (C_pad + E_pad + 3 * H_pad + O_pad) * 4
    est = 2 * (w_bytes + b_bytes) + 2 * tile_bytes + interm_bytes
    vmem_limit_bytes = int(min(max(2 * est, 32 << 20), 48 << 20))

    # ---- pallas call: batch-tiled indices/output, weights VMEM-resident ------
    resident = lambda shape: pl.BlockSpec(shape, lambda i: (0, 0))

    out_p = pl.pallas_call(
        categorical_nn_kernel,
        out_shape=jax.ShapeDtypeStruct((B_pad, O_pad), jnp.float32),
        grid=(n_tiles,),
        in_specs=[
            pl.BlockSpec((TB, NV), lambda i: (i, 0)),    # indices (tiled)
            resident((C_pad, E_pad)),                    # combined embedding
            resident((E_pad, H_pad)),                    # w1
            resident((1, H_pad)),                        # b1
            resident((H_pad, H_pad)),                    # w2
            resident((1, H_pad)),                        # b2
            resident((H_pad, O_pad)),                    # w3
            resident((1, O_pad)),                        # b3
        ],
        out_specs=pl.BlockSpec((TB, O_pad), lambda i: (i, 0)),
        compiler_params=pltpu.CompilerParams(
            dimension_semantics=("parallel",),           # megacore on v7x
            vmem_limit_bytes=vmem_limit_bytes),
        cost_estimate=cost,
    )(idx_g, w_emb, w1_p, b1_p, w2_p, b2_p, w3_p, b3_p)

    return out_p[:B, :O]


# ----------------------- deterministic parameter init ------------------------
def init_params(key, num_categories_list, embedding_dim_list, hidden_dim,
                output_dim):
    keys = jax.random.split(key, len(num_categories_list) + 6)
    params = {}
    # nn.Embedding default init: N(0, 1)
    params["embeddings"] = [
        jax.random.normal(keys[i], (nc, ed), dtype=jnp.float32)
        for i, (nc, ed) in enumerate(zip(num_categories_list,
                                         embedding_dim_list))
    ]
    total_emb = sum(embedding_dim_list)

    def linear_init(kw, kb, fan_in, fan_out):
        bound = 1.0 / jnp.sqrt(float(fan_in))
        w = jax.random.uniform(kw, (fan_in, fan_out), jnp.float32,
                               -bound, bound)
        b = jax.random.uniform(kb, (1, fan_out), jnp.float32, -bound, bound)
        return w, b

    o = len(num_categories_list)
    params["w1"], params["b1"] = linear_init(keys[o + 0], keys[o + 1],
                                             total_emb, hidden_dim)
    params["w2"], params["b2"] = linear_init(keys[o + 2], keys[o + 3],
                                             hidden_dim, hidden_dim)
    params["w3"], params["b3"] = linear_init(keys[o + 4], keys[o + 5],
                                             hidden_dim, output_dim)
    return params


# ------------------------------ reference (JAX) -------------------------------
def reference_forward(x_idx, params):
    embedded = []
    for i, table in enumerate(params["embeddings"]):
        idx_i = x_idx[:, i]
        e_i = jnp.take(table, idx_i, axis=0)
        m_i = (idx_i != 0).astype(jnp.float32)[:, None]
        embedded.append(e_i * m_i)
    x = jnp.concatenate(embedded, axis=1)
    x = jnp.maximum(x @ params["w1"] + params["b1"], 0.0)
    x = jnp.maximum(x @ params["w2"] + params["b2"], 0.0)
    return x @ params["w3"] + params["b3"]


if __name__ == "__main__":
    # NOTE: at this demo size the Pallas call is a smoke test only (launch
    # overhead >> ~13 KFLOP of work); the tiled path pays off at large batch.
    num_categories_list = [5, 7, 4]
    embedding_dim_list = [3, 4, 5]
    hidden_dim = 32
    output_dim = 16
    batch = 8

    key = jax.random.PRNGKey(0)
    k_params, k_x = jax.random.split(key)
    params = init_params(k_params, num_categories_list, embedding_dim_list,
                         hidden_dim, output_dim)

    # integer categorical inputs (0 == "missing" index -> masked out)
    x_idx = jnp.stack(
        [jax.random.randint(jax.random.fold_in(k_x, i), (batch,), 0, nc)
         for i, nc in enumerate(num_categories_list)],
        axis=1).astype(jnp.int32)                              # [B, num_vars]

    out = categorical_nn_forward(x_idx, params)
    out = jax.block_until_ready(out)

    ref = reference_forward(x_idx, params)
    assert out.shape == (batch, output_dim)
    # bf16 matmul operands (f32 accumulation) -> widened tolerance vs f32 ref.
    assert jnp.allclose(out, ref, atol=5e-2, rtol=5e-2)

    print("KERNEL_OK")
</pallas_src>

<mosaic_0001>
module attributes {stable_mosaic.version = 11 : i64} {
  func.func @categorical_nn_kernel(%arg0: i32, %arg1: memref<16x3xi32, #tpu.memory_space<vmem>>, %arg2: memref<128x128xbf16, #tpu.memory_space<vmem>>, %arg3: memref<128x128xbf16, #tpu.memory_space<vmem>>, %arg4: memref<1x128xf32, #tpu.memory_space<vmem>>, %arg5: memref<128x128xbf16, #tpu.memory_space<vmem>>, %arg6: memref<1x128xf32, #tpu.memory_space<vmem>>, %arg7: memref<128x128xbf16, #tpu.memory_space<vmem>>, %arg8: memref<1x128xf32, #tpu.memory_space<vmem>>, %arg9: memref<16x128xf32, #tpu.memory_space<vmem>>) attributes {dimension_semantics = [#tpu.dimension_semantics<parallel>], iteration_bounds = array<i64: 2>, scalar_prefetch = 0 : i64, scratch_operands = 0 : i64, tpu.core_type = #tpu.core_type<tc>, window_params = [{transform_indices = @transform_0, window_bounds = array<i64: 16, 3>}, {pipeline_mode = #tpu.pipeline_mode<synchronous>, transform_indices = @transform_1, window_bounds = array<i64: 128, 128>}, {pipeline_mode = #tpu.pipeline_mode<synchronous>, transform_indices = @transform_2, window_bounds = array<i64: 128, 128>}, {pipeline_mode = #tpu.pipeline_mode<synchronous>, transform_indices = @transform_3, window_bounds = array<i64: 1, 128>}, {pipeline_mode = #tpu.pipeline_mode<synchronous>, transform_indices = @transform_4, window_bounds = array<i64: 128, 128>}, {pipeline_mode = #tpu.pipeline_mode<synchronous>, transform_indices = @transform_5, window_bounds = array<i64: 1, 128>}, {pipeline_mode = #tpu.pipeline_mode<synchronous>, transform_indices = @transform_6, window_bounds = array<i64: 128, 128>}, {pipeline_mode = #tpu.pipeline_mode<synchronous>, transform_indices = @transform_7, window_bounds = array<i64: 1, 128>}, {transform_indices = @transform_8, window_bounds = array<i64: 16, 128>}]} {
    %c0 = arith.constant 0 : index
    %c0_0 = arith.constant 0 : index
    %0 = vector.load %arg1[%c0, %c0_0] : memref<16x3xi32, #tpu.memory_space<vmem>>, vector<16x3xi32>
    %1 = tpu.iota {dimensions = array<i32: 1>} : vector<16x128xi32>
    %cst = arith.constant 0.000000e+00 : f32
    %2 = vector.broadcast %cst : f32 to vector<16x128xf32>
    %3 = vector.extract_strided_slice %0 {offsets = [0, 0], sizes = [16, 1], strides = [1, 1]} : vector<16x3xi32> to vector<16x1xi32>
    %4 = vector.broadcast %3 : vector<16x1xi32> to vector<16x128xi32>
    %5 = arith.cmpi eq, %1, %4 : vector<16x128xi32>
    %6 = arith.extui %5 : vector<16x128xi1> to vector<16x128xi32>
    %7 = arith.sitofp %6 : vector<16x128xi32> to vector<16x128xf32>
    %8 = arith.addf %2, %7 : vector<16x128xf32>
    %9 = vector.extract_strided_slice %0 {offsets = [0, 1], sizes = [16, 1], strides = [1, 1]} : vector<16x3xi32> to vector<16x1xi32>
    %10 = vector.broadcast %9 : vector<16x1xi32> to vector<16x128xi32>
    %11 = arith.cmpi eq, %1, %10 : vector<16x128xi32>
    %12 = arith.extui %11 : vector<16x128xi1> to vector<16x128xi32>
    %13 = arith.sitofp %12 : vector<16x128xi32> to vector<16x128xf32>
    %14 = arith.addf %8, %13 : vector<16x128xf32>
    %15 = vector.extract_strided_slice %0 {offsets = [0, 2], sizes = [16, 1], strides = [1, 1]} : vector<16x3xi32> to vector<16x1xi32>
    %16 = vector.broadcast %15 : vector<16x1xi32> to vector<16x128xi32>
    %17 = arith.cmpi eq, %1, %16 : vector<16x128xi32>
    %18 = arith.extui %17 : vector<16x128xi1> to vector<16x128xi32>
    %19 = arith.sitofp %18 : vector<16x128xi32> to vector<16x128xf32>
    %20 = arith.addf %14, %19 : vector<16x128xf32>
    %21 = arith.truncf %20 : vector<16x128xf32> to vector<16x128xbf16>
    %c0_1 = arith.constant 0 : index
    %c0_2 = arith.constant 0 : index
    %22 = vector.load %arg2[%c0_1, %c0_2] : memref<128x128xbf16, #tpu.memory_space<vmem>>, vector<128x128xbf16>
    %cst_3 = arith.constant dense<0.000000e+00> : vector<16x128xf32>
    %23 = tpu.matmul %21, %22, %cst_3 {dimension_numbers = #tpu.dot_dimension_numbers<[1], [0], [0], [1], [0, 0, 1, 1], [], []>} : vector<16x128xbf16>, vector<128x128xbf16>, vector<16x128xf32> -> vector<16x128xf32>
    %24 = arith.truncf %23 : vector<16x128xf32> to vector<16x128xbf16>
    %c0_4 = arith.constant 0 : index
    %c0_5 = arith.constant 0 : index
    %25 = vector.load %arg3[%c0_4, %c0_5] : memref<128x128xbf16, #tpu.memory_space<vmem>>, vector<128x128xbf16>
    %cst_6 = arith.constant dense<0.000000e+00> : vector<16x128xf32>
    %26 = tpu.matmul %24, %25, %cst_6 {dimension_numbers = #tpu.dot_dimension_numbers<[1], [0], [0], [1], [0, 0, 1, 1], [], []>} : vector<16x128xbf16>, vector<128x128xbf16>, vector<16x128xf32> -> vector<16x128xf32>
    %c0_7 = arith.constant 0 : index
    %c0_8 = arith.constant 0 : index
    %27 = vector.load %arg4[%c0_7, %c0_8] : memref<1x128xf32, #tpu.memory_space<vmem>>, vector<1x128xf32>
    %28 = vector.broadcast %27 : vector<1x128xf32> to vector<16x128xf32>
    %29 = arith.addf %26, %28 : vector<16x128xf32>
    %cst_9 = arith.constant 0.000000e+00 : f32
    %30 = vector.broadcast %cst_9 : f32 to vector<16x128xf32>
    %31 = arith.maximumf %29, %30 : vector<16x128xf32>
    %32 = arith.truncf %31 : vector<16x128xf32> to vector<16x128xbf16>
    %c0_10 = arith.constant 0 : index
    %c0_11 = arith.constant 0 : index
    %33 = vector.load %arg5[%c0_10, %c0_11] : memref<128x128xbf16, #tpu.memory_space<vmem>>, vector<128x128xbf16>
    %cst_12 = arith.constant dense<0.000000e+00> : vector<16x128xf32>
    %34 = tpu.matmul %32, %33, %cst_12 {dimension_numbers = #tpu.dot_dimension_numbers<[1], [0], [0], [1], [0, 0, 1, 1], [], []>} : vector<16x128xbf16>, vector<128x128xbf16>, vector<16x128xf32> -> vector<16x128xf32>
    %c0_13 = arith.constant 0 : index
    %c0_14 = arith.constant 0 : index
    %35 = vector.load %arg6[%c0_13, %c0_14] : memref<1x128xf32, #tpu.memory_space<vmem>>, vector<1x128xf32>
    %36 = vector.broadcast %35 : vector<1x128xf32> to vector<16x128xf32>
    %37 = arith.addf %34, %36 : vector<16x128xf32>
    %cst_15 = arith.constant 0.000000e+00 : f32
    %38 = vector.broadcast %cst_15 : f32 to vector<16x128xf32>
    %39 = arith.maximumf %37, %38 : vector<16x128xf32>
    %40 = arith.truncf %39 : vector<16x128xf32> to vector<16x128xbf16>
    %c0_16 = arith.constant 0 : index
    %c0_17 = arith.constant 0 : index
    %41 = vector.load %arg7[%c0_16, %c0_17] : memref<128x128xbf16, #tpu.memory_space<vmem>>, vector<128x128xbf16>
    %cst_18 = arith.constant dense<0.000000e+00> : vector<16x128xf32>
    %42 = tpu.matmul %40, %41, %cst_18 {dimension_numbers = #tpu.dot_dimension_numbers<[1], [0], [0], [1], [0, 0, 1, 1], [], []>} : vector<16x128xbf16>, vector<128x128xbf16>, vector<16x128xf32> -> vector<16x128xf32>
    %c0_19 = arith.constant 0 : index
    %c0_20 = arith.constant 0 : index
    %43 = vector.load %arg8[%c0_19, %c0_20] : memref<1x128xf32, #tpu.memory_space<vmem>>, vector<1x128xf32>
    %44 = vector.broadcast %43 : vector<1x128xf32> to vector<16x128xf32>
    %45 = arith.addf %42, %44 : vector<16x128xf32>
    %c0_21 = arith.constant 0 : index
    %c0_22 = arith.constant 0 : index
    %46 = vector.load %arg9[%c0_21, %c0_22] : memref<16x128xf32, #tpu.memory_space<vmem>>, vector<16x128xf32>
    tpu.vector_store %arg9[%c0_21, %c0_22], %45 {strides = array<i32>} : memref<16x128xf32, #tpu.memory_space<vmem>>, vector<16x128xf32>,
    return
  }
  func.func @transform_0(%arg0: i32) -> (i32, i32) {
    %c0_i32 = arith.constant 0 : i32
    %c0_i32_0 = arith.constant 0 : i32
    return %arg0, %c0_i32 : i32, i32
  }
  func.func @transform_1(%arg0: i32) -> (i32, i32) {
    %c0_i32 = arith.constant 0 : i32
    %c0_i32_0 = arith.constant 0 : i32
    %c0_i32_1 = arith.constant 0 : i32
    return %c0_i32, %c0_i32_0 : i32, i32
  }
  func.func @transform_2(%arg0: i32) -> (i32, i32) {
    %c0_i32 = arith.constant 0 : i32
    %c0_i32_0 = arith.constant 0 : i32
    %c0_i32_1 = arith.constant 0 : i32
    return %c0_i32, %c0_i32_0 : i32, i32
  }
  func.func @transform_3(%arg0: i32) -> (i32, i32) {
    %c0_i32 = arith.constant 0 : i32
    %c0_i32_0 = arith.constant 0 : i32
    %c0_i32_1 = arith.constant 0 : i32
    return %c0_i32, %c0_i32_0 : i32, i32
  }
  func.func @transform_4(%arg0: i32) -> (i32, i32) {
    %c0_i32 = arith.constant 0 : i32
    %c0_i32_0 = arith.constant 0 : i32
    %c0_i32_1 = arith.constant 0 : i32
    return %c0_i32, %c0_i32_0 : i32, i32
  }
  func.func @transform_5(%arg0: i32) -> (i32, i32) {
    %c0_i32 = arith.constant 0 : i32
    %c0_i32_0 = arith.constant 0 : i32
    %c0_i32_1 = arith.constant 0 : i32
    return %c0_i32, %c0_i32_0 : i32, i32
  }
  func.func @transform_6(%arg0: i32) -> (i32, i32) {
    %c0_i32 = arith.constant 0 : i32
    %c0_i32_0 = arith.constant 0 : i32
    %c0_i32_1 = arith.constant 0 : i32
    return %c0_i32, %c0_i32_0 : i32, i32
  }
  func.func @transform_7(%arg0: i32) -> (i32, i32) {
    %c0_i32 = arith.constant 0 : i32
    %c0_i32_0 = arith.constant 0 : i32
    %c0_i32_1 = arith.constant 0 : i32
    return %c0_i32, %c0_i32_0 : i32, i32
  }
  func.func @transform_8(%arg0: i32) -> (i32, i32) {
    %c0_i32 = arith.constant 0 : i32
    %c0_i32_0 = arith.constant 0 : i32
    return %arg0, %c0_i32 : i32, i32
  }
}

</mosaic_0001>

<bundles_post_ra>
// kernel: tpu_custom_call.1
= control target key start
LH: loop header
LB: loop body
LE: loop exit
PB: predicated region body
PF: predicated region fallthrough
CT: control target
= control target key end

     0   :  { %13 = vsyncpa [#allocation3], 0  ;;  %s1822_s0 = inlined_call_operand.vmem [shape: s32[32,3], index: 0, kind: input, shape index: {}]   ;;  %s1823_s1 = inlined_call_operand.hbm [shape: bf16[128,128], index: 1, kind: input, shape index: {}]   ;;  %s1824_s2 = inlined_call_operand.hbm [shape: bf16[128,128], index: 2, kind: input, shape index: {}]   ;;  %s1825_s3 = inlined_call_operand.vmem [shape: f32[1,128], index: 3, kind: input, shape index: {}]   ;;  %s1826_s4 = inlined_call_operand.hbm [shape: bf16[128,128], index: 4, kind: input, shape index: {}]   ;;  %s1827_s5 = inlined_call_operand.vmem [shape: f32[1,128], index: 5, kind: input, shape index: {}]   ;;  %s1828_s6 = inlined_call_operand.hbm [shape: bf16[128,128], index: 6, kind: input, shape index: {}]   ;;  %s1829_s7 = inlined_call_operand.vmem [shape: f32[1,128], index: 7, kind: input, shape index: {}]   ;;  %s1830_s8 = inlined_call_operand.hbm [shape: f32[32,128], index: 8, kind: output, shape index: {}]  }
   0x1   :  { %14 = vsyncpa [#allocation6], 0 }
   0x2   :  { %15 = vsyncpa [#allocation9], 0 }
   0x3   :  { %16 = vsyncpa [#allocation4], 0 }
   0x4   :  { %18 = vsyncpa [#allocation4 + $0x1], 0  ;;  %s1531_s27 = smov 0   ;;  %s1533_s28 = smov 0  }
   0x5   :  { %s1535_s29 = smov 0   ;;  %s1537_s30 = smov 0  }
   0x6 LB: > { %1838 = sst [smem:[#allocation15_spill]] %s1466_s29  ;;  %s1552_s9 = sadd.s32 4294967295, %s1470_s30   ;;  %s1470_s30 = sphi %s1537_s30, %s1857_s30   ;;  %s1466_s29 = sphi %s1535_s29, %s1859_s29   ;;  %s1462_s28 = sphi %s1533_s28, %s1861_s28   ;;  %s1458_s27 = sphi %s1531_s27, %s1860_s27  }
   0x7   : > { %s981_s10 = sadd.s32 4294967294, %s1470_s30   ;;  %s1556_s11 = sadd.s32 1, %s1470_s30  }
   0x8   : > { %1839 = sst [smem:[#allocation16_spill]] %s1556_s11  ;;  %s204_s12 = sadd.s32 1, %s1466_s29 }
   0x9   : > { %s201_s13 = ssub.s32 %s1470_s30, %s1556_s11  ;;  %p214_p0 = scmp.ne.s32.totalorder %s1466_s29, %s1462_s28 }
   0xa   : > { %p202_p1 = scmp.eq.s32.totalorder %s201_s13, 0  ;;  %p215_p2 = scmp.eq.s32.totalorder %s1552_s9, 1 }
   0xb   : > { %p220_p3 = scmp.ne.s32.totalorder %s1462_s28, %s1458_s27  ;;  %p221_p4 = scmp.eq.s32.totalorder %s981_s10, 1 }
   0xc   : > { %s1567_s14 = scalar_select %p202_p1, %s1466_s29, %s204_s12  }
   0xd   : > { %p1569_p5 = por %p215_p2, %p214_p0  ;;  %p1573_p6 = por %p221_p4, %p220_p3 }
   0xe   : > { %1840 = sst [smem:[#allocation17_spill]] %s1567_s14  ;;  %p982_p7 = scmp.ge.s32.totalorder %s1470_s30, 1 }
   0xf   : > { %s1841_s15 = scalar_select %p1569_p5, 1, 0 }
  0x10   : > { %s1842_s16 = scalar_select %p1573_p6, 1, 0 }
  0x11   : > { %p228_p8 = scmp.lt.s32.totalorder %s1470_s30, 3  ;;  %p1831_p9 = scmp.eq.s32.totalorder %s1552_s9, 0 }
  0x12   : > { %1843 = sst [smem:[#allocation18_spill]] %s1842_s16  ;;  %s1472_s18 = smov [#allocation5]  }
  0x13   : > { %p1580_p10 = pnand %p982_p7, %p228_p8  ;;  %s253_s19 = sshll.u32 %s1472_s18, 4  ;;  %s1586_s19 = int_to_ptr.vmem [resolvable:$true] %s253_s19 }
  0x14   : > { %s1473_s21 = smov [#allocation2]   ;;  %s1474_s23 = smov [#allocation7]  }
  0x15   : > { %s1844_s17 = scalar_select %p1580_p10, 1, 0 }
  0x16   : > { %p1177_p11 = pneg %p1580_p10  ;;  %s240_s22 = sshll.u32 %s1473_s21, 4  ;;  %s1594_s22 = int_to_ptr.vmem [resolvable:$true] %s240_s22 }
  0x17   : > { %s1596_s24 = sshll.u32 %s1474_s23, 4  ;;  %s1284_s10 = scalar_lea.hbm %s1824_s2, 1024  ;;  %s270_s24 = int_to_ptr.vmem [resolvable:$true] %s1596_s24 }
  0x18   : > { %p1590_p12 = pnand %p1831_p9, %p1177_p11  ;;  %p1285_p13 = scmp.ne.s32.totalorder %s1824_s2, %s1284_s10 }
  0x19   : > { %p1291_p3 = scmp.lt.u32.totalorder %s1284_s10, %s1824_s2 }
  0x1a   : > { %p1606_p0 = pneg %p1590_p12 }
  0x1c   : > { %p1287_p1 = pnand %p1606_p0, %p1285_p13 }
  0x1e   : > { %p1288_p2 = pneg %p1287_p1 }
  0x20   : > { %p1293_p4 = pnand %p1291_p3, %p1288_p2 }
  0x22   : > { %1296 = shalt.err (!%p1293_p4)
}
  0x23   : > { %s1297_s25 = scalar_lea.vmem %s1586_s19, 1024  ;;  %p1305_p9 = scmp.lt.s32.totalorder %s1586_s19, %s1586_s19 }
  0x24   : > { %p1298_p7 = scmp.ne.s32.totalorder %s1586_s19, %s1297_s25  ;;  %p1306_p6 = scmp.lt.s32.totalorder %s1297_s25, %s1297_s25 }
  0x26   : > { %p1300_p8 = pnand %p1298_p7, %p1606_p0  ;;  %p1307_p13 = por %p1306_p6, %p1305_p9 }
  0x28   : > { %p1301_p11 = pneg %p1300_p8 }
  0x2a   : > { %p1308_p1 = pnand %p1307_p13, %p1301_p11 }
  0x2c   : > { %1311 = shalt.err (!%p1308_p1)
}
  0x2d   : > { %s1475_s26 = smov 64   ;;  %s1476_s10 = smov 4  }
  0x2e   : > { %1183 = dma.hbm_to_vmem [thread:$0]  (!%p1590_p12), %s1824_s2, 1024, %s1586_s19, [#allocation6], %s1475_s26, %s1475_s26, %s1476_s10  }
  0x2f   : > { %s1312_s25 = scalar_lea.hbm %s1823_s1, 1024 }
  0x30   : > { %p1313_p6 = scmp.ne.s32.totalorder %s1823_s1, %s1312_s25  ;;  %p1319_p3 = scmp.lt.u32.totalorder %s1312_s25, %s1823_s1 }
  0x32   : > { %p1315_p9 = pnand %p1313_p6, %p1606_p0 }
  0x34   : > { %p1316_p2 = pneg %p1315_p9 }
  0x36   : > { %p1321_p4 = pnand %p1319_p3, %p1316_p2 }
  0x38   : > { %1324 = shalt.err (!%p1321_p4)
}
  0x39   : > { %s1325_s19 = scalar_lea.vmem %s1594_s22, 1024  ;;  %p1333_p13 = scmp.lt.s32.totalorder %s1594_s22, %s1594_s22 }
  0x3a   : > { %p1326_p7 = scmp.ne.s32.totalorder %s1594_s22, %s1325_s19  ;;  %p1334_p1 = scmp.lt.s32.totalorder %s1325_s19, %s1325_s19 }
  0x3c   : > { %p1328_p8 = pnand %p1326_p7, %p1606_p0  ;;  %p1335_p6 = por %p1334_p1, %p1333_p13 }
  0x3e   : > { %p1329_p11 = pneg %p1328_p8 }
  0x40   : > { %p1336_p9 = pnand %p1335_p6, %p1329_p11 }
  0x42   : > { %1339 = shalt.err (!%p1336_p9)
}
  0x43   : > { %1180 = dma.hbm_to_vmem [thread:$0]  (!%p1590_p12), %s1823_s1, 1024, %s1594_s22, [#allocation3], %s1475_s26, %s1475_s26, %s1476_s10  }
  0x44   : > { %s1340_s12 = scalar_lea.hbm %s1826_s4, 1024 }
  0x45   : > { %p1341_p2 = scmp.ne.s32.totalorder %s1826_s4, %s1340_s12  ;;  %p1347_p7 = scmp.lt.u32.totalorder %s1340_s12, %s1826_s4 }
  0x47   : > { %p1343_p3 = pnand %p1341_p2, %p1606_p0 }
  0x49   : > { %p1344_p4 = pneg %p1343_p3 }
  0x4b   : > { %p1349_p8 = pnand %p1347_p7, %p1344_p4 }
  0x4d   : > { %1352 = shalt.err (!%p1349_p8)
}
  0x4e   : > { %s1353_s19 = scalar_lea.vmem %s270_s24, 1024  ;;  %p1361_p6 = scmp.lt.s32.totalorder %s270_s24, %s270_s24 }
  0x4f   : > { %p1354_p11 = scmp.ne.s32.totalorder %s270_s24, %s1353_s19  ;;  %p1362_p9 = scmp.lt.s32.totalorder %s1353_s19, %s1353_s19 }
  0x51   : > { %p1356_p13 = pnand %p1354_p11, %p1606_p0  ;;  %p1363_p5 = por %p1362_p9, %p1361_p6 }
  0x53   : > { %p1357_p1 = pneg %p1356_p13 }
  0x55   : > { %p1364_p10 = pnand %p1363_p5, %p1357_p1 }
  0x57   : > { %1367 = shalt.err (!%p1364_p10)
}
  0x58   : > { %1186 = dma.hbm_to_vmem [thread:$0]  (!%p1590_p12), %s1826_s4, 1024, %s270_s24, [#allocation6], %s1475_s26, %s1475_s26, %s1476_s10  }
  0x59   : > { %s1477_s11 = smov [#allocation8]   ;;  %s1368_s13 = scalar_lea.hbm %s1828_s6, 1024 }
  0x5a   : > { %s285_s14 = sshll.u32 %s1477_s11, 4  ;;  %p1369_p5 = scmp.ne.s32.totalorder %s1828_s6, %s1368_s13  ;;  %s286_s14 = int_to_ptr.vmem [resolvable:$true] %s285_s14 }
  0x5b   : > { %p1375_p3 = scmp.lt.u32.totalorder %s1368_s13, %s1828_s6 }
  0x5c   : > { %p1371_p10 = pnand %p1369_p5, %p1606_p0 }
  0x5e   : > { %p1372_p2 = pneg %p1371_p10 }
  0x60   : > { %p1377_p4 = pnand %p1375_p3, %p1372_p2 }
  0x62   : > { %1380 = shalt.err (!%p1377_p4)
}
  0x63   : > { %s1381_s24 = scalar_lea.vmem %s286_s14, 1024  ;;  %p1389_p13 = scmp.lt.s32.totalorder %s286_s14, %s286_s14 }
  0x64   : > { %p1382_p7 = scmp.ne.s32.totalorder %s286_s14, %s1381_s24  ;;  %p1390_p1 = scmp.lt.s32.totalorder %s1381_s24, %s1381_s24 }
  0x66   : > { %p1384_p8 = pnand %p1382_p7, %p1606_p0  ;;  %p1391_p6 = por %p1390_p1, %p1389_p13 }
  0x68   : > { %p1385_p11 = pneg %p1384_p8 }
  0x6a   : > { %p1392_p9 = pnand %p1391_p6, %p1385_p11 }
  0x6c   : > { %1395 = shalt.err (!%p1392_p9)
}
  0x6d   : > { %1189 = dma.hbm_to_vmem [thread:$0]  (!%p1590_p12), %s1828_s6, 1024, %s286_s14, [#allocation9], %s1475_s26, %s1475_s26, %s1476_s10  }
  0x6e   : > { %p1847_p5 = scmp.ne.s32.totalorder %s1844_s17, 0 }
  0x6f   : > { %p1848_p0 = scmp.eq.s32.totalorder (!%p1847_p5), %s1552_s9, 0 }
  0x70   : > { %313 = sbr.rel (%p1847_p5) target bundleno = 1163 (0x48b), region = 52 }
  0x77   : > { %1441 = dma.done.wait (%p1848_p0), [#allocation3], 1024   ;;  %p1849_p10 = pmov %p1848_p0 }
  0x78   : > { %p1850_p2 = pmov %p1848_p0 }
  0x79   : > { %1443 = vsyncadd (%p1849_p10), [#allocation3], 4294966272 }
  0x7a   : > { %1445 = dma.done.wait (%p1850_p2), [#allocation6], 2048   ;;  %p1851_p3 = pmov %p1848_p0 }
  0x7b   : > { %p1852_p4 = pmov %p1848_p0 }
  0x7c   : > { %1447 = vsyncadd (%p1851_p3), [#allocation6], 4294965248 }
  0x7d   : > { %1449 = dma.done.wait (%p1852_p4), [#allocation9], 1024   ;;  %p1853_p12 = pmov %p1848_p0 }
  0x7e   : > { %s994_s17 = sshll.u32 %s1552_s9, 1  ;;  %v1478_v0 = vmov 1   ;;  %v1479_v1 = vmov 0   ;;  %v1480_v2 = vmov 0.0   ;;  %v1252_v4 = vld [vmem:[#allocation2] sm:$0xff]   ;;  %v1253_v6 = vld [vmem:[#allocation2 + $0x8] sm:$0xff]   ;;  %v369_v21 = vlaneseq }
  0x7f   : > { %1451 = vsyncadd (%p1853_p12), [#allocation9], 4294966272  ;;  %1249 = vset.pattern.permute.xlu1 %v1478_v0  ;;  %1248 = vset.pattern.permute.xlu0 %v1479_v1  ;;  %p360_p7 = scmp.lt.s32.totalorder %s994_s17, 3  ;;  %v1254_v7 = vld [vmem:[#allocation2 + $0x10] sm:$0xff]   ;;  %v1481_v8 = vmov 2   ;;  %v1255_v9 = vld [vmem:[#allocation2 + $0x18] sm:$0xff]  }
  0x80   : > { %1079 = vmatprep.subr.bf16.mxu0 %v1480_v2  ;;  %1099 = vmatprep.subr.bf16.mxu1 %v1480_v2  ;;  %v1256_v10 = vld [vmem:[#allocation2 + $0x20] sm:$0xff]   ;;  %vm1482_vm0 = vmmov 0   ;;  %v1257_v12 = vld [vmem:[#allocation2 + $0x28] sm:$0xff]   ;;  %v1262_v14 = vld [vmem:[#allocation5 + $0x10] sm:$0xff]   ;;  %v370_v22 = vand.u32 127, %v369_v21  ;;  %s356_s13 = sand.u32 1, %s1462_s28  }
  0x81   : > { %s1863_s17 = smov (!%p360_p7, %s994_s17), 3  ;;  %1080 = vmatpush3.bf16.msra.mxu0 %v1252_v4  ;;  %1095 = vmatprep.mubr.msk.bf16.mxu0 %vm1482_vm0, %v1480_v2  ;;  %v1260_v11 = vld [vmem:[#allocation5] sm:$0xff]   ;;  %v1261_v13 = vld [vmem:[#allocation5 + $0x8] sm:$0xff]   ;;  %v1258_v15 = vld [vmem:[#allocation2 + $0x30] sm:$0xff]   ;;  %s993_s21 = sshll.u32 %s356_s13, 4 }
  0x82   : > { %s995_s20 = sshll.u32 %s1863_s17, 3  ;;  %1081 = vmatprep.subr.bf16.mxu0 %v1480_v2  ;;  %1115 = vmatprep.mubr.msk.bf16.mxu1 %vm1482_vm0, %v1480_v2  ;;  %v1263_v16 = vld [vmem:[#allocation5 + $0x18] sm:$0xff]   ;;  %v1264_v18 = vld [vmem:[#allocation5 + $0x20] sm:$0xff]   ;;  %v1265_v19 = vld [vmem:[#allocation5 + $0x28] sm:$0xff]   ;;  %s358_s19 = scalar_lea.vmem [#allocation10], %s993_s21 }
  0x83   : > { %s363_s10 = scalar_lea.vmem %s1822_s0, %s995_s20  ;;  %1100 = vmatpush3.bf16.msra.mxu1 %v1260_v11  ;;  %v1259_v17 = vld [vmem:[#allocation2 + $0x38] sm:$0xff]   ;;  %v1266_v20 = vld [vmem:[#allocation5 + $0x30] sm:$0xff]   ;;  %v1268_v41 = vld [vmem:[#allocation7] sm:$0xff]   ;;  %s878_s24 = sshll.u32 %s358_s19, 4  ;;  %s1774_s24 = int_to_ptr.vmem [resolvable:$true] %s878_s24 }
  0x84   : > { %v367_v3 = vld [vmem:[%s363_s10] sm:$0xff]  ;;  %v368_v5 = vld [vmem:[%s363_s10 + $0x8] sm:$0xff]  ;;  %1101 = vmatprep.subr.bf16.mxu1 %v1480_v2  ;;  %v1267_v40 = vld [vmem:[#allocation5 + $0x38] sm:$0xff]   ;;  %s1042_s22 = sshll.u32 %s1552_s9, 8  ;;  %s1781_s18 = scalar_lea.sflag [#allocation4], %s356_s13 }
  0x85   : > { %386 = vperm.xlu1 %1249, %v367_v3   ;;  %372 = vperm.xlu0 %1248, %v367_v3   ;;  %v1269_v42 = vld [vmem:[#allocation7 + $0x8] sm:$0xff]   ;;  %v1270_v43 = vld [vmem:[#allocation7 + $0x10] sm:$0xff]   ;;  %v1271_v44 = vld [vmem:[#allocation7 + $0x18] sm:$0xff]   ;;  %s1779_s20 = scalar_lea.hbm %s1830_s8, %s1042_s22  ;;  %s1396_s9 = scalar_lea.vmem %s1774_s24, 256 }
  0x86   : > { %1082 = vmatpush3.bf16.msra.mxu0 %v1253_v6  ;;  %v1272_v45 = vld [vmem:[#allocation7 + $0x20] sm:$0xff]   ;;  %v1273_v46 = vld [vmem:[#allocation7 + $0x28] sm:$0xff]   ;;  %v1274_v52 = vld [vmem:[#allocation7 + $0x30] sm:$0xff]   ;;  %p1397_p8 = scmp.ne.s32.totalorder %s1774_s24, %s1396_s9  ;;  %p1854_p11 = scmp.ne.s32.totalorder %s1841_s15, 0 }
  0x87   : > { %1083 = vmatprep.subr.bf16.mxu0 %v1480_v2  ;;  %1102 = vmatpush3.bf16.msra.mxu1 %v1261_v13  ;;  %v1275_v53 = vld [vmem:[#allocation7 + $0x38] sm:$0xff]   ;;  %v1276_v54 = vld [vmem:[#allocation8] sm:$0xff]   ;;  %v1277_v55 = vld [vmem:[#allocation8 + $0x8] sm:$0xff]   ;;  %s1483_s26 = smov [#allocation10]  }
  0x88   : > { %1103 = vmatprep.subr.bf16.mxu1 %v1480_v2  ;;  %v1278_v56 = vld [vmem:[#allocation8 + $0x10] sm:$0xff]   ;;  %v1279_v57 = vld [vmem:[#allocation8 + $0x18] sm:$0xff]   ;;  %v1280_v58 = vld [vmem:[#allocation8 + $0x20] sm:$0xff]   ;;  %p1398_p13 = pnand %p1397_p8, %p1854_p11  ;;  %s1400_s10 = sshll.u32 %s1483_s26, 4  ;;  %s1401_s10 = int_to_ptr.vmem [resolvable:$false] %s1400_s10 }
  0x89   : > { %389 = vperm.xlu1 %1249, %v368_v5   ;;  %375 = vperm.xlu0 %1248, %v368_v5   ;;  %v1281_v59 = vld [vmem:[#allocation8 + $0x28] sm:$0xff]   ;;  %v1010_v60 = vld [vmem:[%s1825_s3] ss:$0 sm:$0xff]  ;;  %s1402_s11 = scalar_lea.vmem %s1401_s10, 512  ;;  %p1403_p6 = scmp.lt.s32.totalorder %s1774_s24, %s1401_s10 }
  0x8a   : > { %1084 = vmatpush3.bf16.msra.mxu0 %v1254_v7  ;;  %v1282_v7 = vld [vmem:[#allocation8 + $0x30] sm:$0xff]   ;;  %p1399_p1 = pneg %p1398_p13  ;;  %p1404_p9 = scmp.lt.s32.totalorder %s1402_s11, %s1396_s9 }
  0x8b   : > { %1085 = vmatprep.subr.bf16.mxu0 %v1480_v2  ;;  %1104 = vmatpush3.bf16.msra.mxu1 %v1262_v14 }
  0x8c   : > { %1105 = vmatprep.subr.bf16.mxu1 %v1480_v2  ;;  %p1405_p5 = por %p1404_p9, %p1403_p6 }
  0x8d   : > { %1251 = vset.pattern.permute.xlu1 %v1481_v8  ;;  %1250 = vset.pattern.permute.xlu0 %v1481_v8  ;;  %v1283_v8 = vld [vmem:[#allocation8 + $0x38] sm:$0xff]  }
  0x8e   : > { %403 = vperm.xlu1 %1251, %v368_v5   ;;  %400 = vperm.xlu0 %1250, %v367_v3   ;;  %p1406_p0 = pnand %p1405_p5, %p1399_p1 }
  0x8f   : > { %1086 = vmatpush3.bf16.msra.mxu0 %v1255_v9  ;;  %1106 = vmatpush3.bf16.msra.mxu1 %v1263_v16  ;;  %v1019_v9 = vld [vmem:[%s1827_s5] ss:$0 sm:$0xff] }
  0x90   : > { %1087 = vmatprep.subr.bf16.mxu0 %v1480_v2  ;;  %1107 = vmatprep.subr.bf16.mxu1 %v1480_v2 }
  0x93   : > { %1088 = vmatpush3.bf16.msra.mxu0 %v1256_v10  ;;  %1108 = vmatpush3.bf16.msra.mxu1 %v1264_v18 }
  0x94   : > { %1089 = vmatprep.subr.bf16.mxu0 %v1480_v2  ;;  %1109 = vmatprep.subr.bf16.mxu1 %v1480_v2 }
  0x97   : > { %1090 = vmatpush3.bf16.msra.mxu0 %v1257_v12  ;;  %1110 = vmatpush3.bf16.msra.mxu1 %v1265_v19 }
  0x98   : > { %1091 = vmatprep.subr.bf16.mxu0 %v1480_v2  ;;  %1111 = vmatprep.subr.bf16.mxu1 %v1480_v2 }
  0x9b   : > { %1092 = vmatpush3.bf16.msra.mxu0 %v1258_v15  ;;  %1112 = vmatpush3.bf16.msra.mxu1 %v1266_v20 }
  0x9c   : > { %1093 = vmatprep.subr.bf16.mxu0 %v1480_v2  ;;  %1113 = vmatprep.subr.bf16.mxu1 %v1480_v2 }
  0x9f   : > { %1094 = vmatpush3.bf16.msra.mxu0 %v1259_v17  ;;  %1114 = vmatpush3.bf16.msra.mxu1 %v1267_v40 }
  0xa0   : > { %1119 = vmatprep.subr.bf16.mxu0 %v1480_v2  ;;  %1139 = vmatprep.subr.bf16.mxu1 %v1480_v2 }
 0x104   : > { %v387_v23 = vpop.permute.xlu1 %386  ;;  %v373_v24 = vpop.permute.xlu0 %372 }
 0x105   : > { %vm391_vm1 = vcmp.eq.s32.totalorder %v370_v22, %v387_v23  ;;  %vm377_vm2 = vcmp.eq.s32.totalorder %v370_v22, %v373_v24 }
 0x106   : > { %v998_v27 = vsel %vm391_vm1, 1.0, %v1480_v2  ;;  %v996_v28 = vsel %vm377_vm2, 1.0, %v1480_v2 }
 0x107   : > { %v397_v33 = vadd.f32 %v998_v27, %v996_v28 }
 0x108   : > { %v390_v25 = vpop.permute.xlu1 %389  ;;  %v376_v26 = vpop.permute.xlu0 %375 }
 0x109   : > { %vm392_vm3 = vcmp.eq.s32.totalorder %v370_v22, %v390_v25  ;;  %vm378_vm4 = vcmp.eq.s32.totalorder %v370_v22, %v376_v26 }
 0x10a   : > { %v999_v29 = vsel %vm392_vm3, 1.0, %v1480_v2  ;;  %v997_v30 = vsel %vm378_vm4, 1.0, %v1480_v2 }
 0x10b   : > { %v398_v34 = vadd.f32 %v999_v29, %v997_v30 }
 0x10d   : > { %v404_v31 = vpop.permute.xlu1 %403  ;;  %v401_v32 = vpop.permute.xlu0 %400 }
 0x10e   : > { %vm406_vm5 = vcmp.eq.s32.totalorder %v370_v22, %v404_v31  ;;  %vm405_vm6 = vcmp.eq.s32.totalorder %v370_v22, %v401_v32 }
 0x10f   : > { %v1001_v35 = vsel %vm406_vm5, 1.0, %v1480_v2  ;;  %v1000_v36 = vsel %vm405_vm6, 1.0, %v1480_v2 }
 0x110   : > { %v412_v37 = vadd.f32 %v1001_v35, %v398_v34  ;;  %v411_v38 = vadd.f32 %v1000_v36, %v397_v33 }
 0x112   : > { %v413_v39 = vpack.c.bf16 %v412_v37, %v411_v38 }
 0x114   : > { %1096 = vmatmul.mubr.bf16.vlgmr.msra.gmra.mrb[0].mxu0 %v413_v39 }
 0x115   : > { %1135 = vmatprep.mubr.msk.bf16.mxu0 %vm1482_vm0, %v1480_v2  ;;  %1120 = vmatpush3.bf16.msra.mxu0 %v1268_v41 }
 0x116   : > { %1121 = vmatprep.subr.bf16.mxu0 %v1480_v2 }
 0x119   : > { %1122 = vmatpush3.bf16.msra.mxu0 %v1269_v42 }
 0x11a   : > { %1123 = vmatprep.subr.bf16.mxu0 %v1480_v2 }
 0x11d   : > { %1124 = vmatpush3.bf16.msra.mxu0 %v1270_v43 }
 0x11e   : > { %1125 = vmatprep.subr.bf16.mxu0 %v1480_v2 }
 0x121   : > { %1126 = vmatpush3.bf16.msra.mxu0 %v1271_v44 }
 0x122   : > { %1127 = vmatprep.subr.bf16.mxu0 %v1480_v2 }
 0x125   : > { %1128 = vmatpush3.bf16.msra.mxu0 %v1272_v45 }
 0x126   : > { %1129 = vmatprep.subr.bf16.mxu0 %v1480_v2 }
 0x129   : > { %1130 = vmatpush3.bf16.msra.mxu0 %v1273_v46 }
 0x12a   : > { %1131 = vmatprep.subr.bf16.mxu0 %v1480_v2 }
 0x12d   : > { %1132 = vmatpush3.bf16.msra.mxu0 %v1274_v52 }
 0x12e   : > { %1133 = vmatprep.subr.bf16.mxu0 %v1480_v2 }
 0x131   : > { %1134 = vmatpush3.bf16.msra.mxu0 %v1275_v53 }
 0x1e7   : > { %v512_v47 = vpop.f32.mrb[0].mxu0 }
 0x1e8   : > { %v1097_v48 = vpop.f32.mrb[1].mxu0 }
 0x1e9   : > { %v515_v49 = vpop.f32.mrb[2].mxu0 }
 0x1ea   : > { %v519_v50 = vpack.c.bf16 %v515_v49, %v512_v47  ;;  %v1098_v51 = vpop.f32.mrb[3].mxu0 }
 0x1ec   : > { %1116 = vmatmul.mubr.bf16.vlgmr.msra.gmra.mrb[0].mxu1 %v519_v50 }
 0x1ed   : > { %1155 = vmatprep.mubr.msk.bf16.mxu1 %vm1482_vm0, %v1480_v2  ;;  %1140 = vmatpush3.bf16.msra.mxu1 %v1276_v54 }
 0x1ee   : > { %1141 = vmatprep.subr.bf16.mxu1 %v1480_v2 }
 0x1f1   : > { %1142 = vmatpush3.bf16.msra.mxu1 %v1277_v55 }
 0x1f2   : > { %1143 = vmatprep.subr.bf16.mxu1 %v1480_v2 }
 0x1f5   : > { %1144 = vmatpush3.bf16.msra.mxu1 %v1278_v56 }
 0x1f6   : > { %1145 = vmatprep.subr.bf16.mxu1 %v1480_v2 }
 0x1f9   : > { %1146 = vmatpush3.bf16.msra.mxu1 %v1279_v57 }
 0x1fa   : > { %1147 = vmatprep.subr.bf16.mxu1 %v1480_v2 }
 0x1fd   : > { %1148 = vmatpush3.bf16.msra.mxu1 %v1280_v58 }
 0x1fe   : > { %1149 = vmatprep.subr.bf16.mxu1 %v1480_v2 }
 0x201   : > { %1150 = vmatpush3.bf16.msra.mxu1 %v1281_v59 }
 0x202   : > { %1151 = vmatprep.subr.bf16.mxu1 %v1480_v2 }
 0x205   : > { %1152 = vmatpush3.bf16.msra.mxu1 %v1282_v7 }
 0x206   : > { %1153 = vmatprep.subr.bf16.mxu1 %v1480_v2  ;;  %v1028_v2 = vld [vmem:[%s1829_s7] ss:$0 sm:$0xff] }
 0x209   : > { %1154 = vmatpush3.bf16.msra.mxu1 %v1283_v8 }
 0x2bf   : > { %v625_v61 = vpop.f32.mrb[0].mxu1 }
 0x2c0   : > { %v626_v62 = vadd.f32 %v1010_v60, %v625_v61  ;;  %v1117_v63 = vpop.f32.mrb[1].mxu1 }
 0x2c1   : > { %v628_v0 = vpop.f32.mrb[2].mxu1 }
 0x2c2   : > { %v629_v1 = vadd.f32 %v1010_v60, %v628_v0  ;;  %v1118_v3 = vpop.f32.mrb[3].mxu1  ;;  %v632_v4 = vmax.f32 %v626_v62, 0.0 }
 0x2c4   : > { %v633_v5 = vmax.f32 %v629_v1, 0.0 }
 0x2c6   : > { %v634_v6 = vpack.c.bf16 %v633_v5, %v632_v4 }
 0x2c8   : > { %1136 = vmatmul.mubr.bf16.vlgmr.msra.gmra.mrb[4].mxu0 %v634_v6 }
 0x39b   : > { %v740_v10 = vpop.f32.mrb[4].mxu0 }
 0x39c   : > { %v741_v11 = vadd.f32 %v1019_v9, %v740_v10  ;;  %v1137_v12 = vpop.f32.mrb[5].mxu0 }
 0x39d   : > { %v743_v13 = vpop.f32.mrb[6].mxu0 }
 0x39e   : > { %v744_v14 = vadd.f32 %v1019_v9, %v743_v13  ;;  %v1138_v15 = vpop.f32.mrb[7].mxu0  ;;  %v747_v16 = vmax.f32 %v741_v11, 0.0 }
 0x3a0   : > { %v748_v17 = vmax.f32 %v744_v14, 0.0 }
 0x3a2   : > { %v749_v18 = vpack.c.bf16 %v748_v17, %v747_v16 }
 0x3a4   : > { %1156 = vmatmul.mubr.bf16.vlgmr.msra.gmra.mrb[4].mxu1 %v749_v18 }
 0x477   : > { %v855_v19 = vpop.f32.mrb[4].mxu1 }
 0x478   : > { %v856_v20 = vadd.f32 %v1028_v2, %v855_v19  ;;  %v1157_v21 = vpop.f32.mrb[5].mxu1 }
 0x479   : > { %v858_v22 = vpop.f32.mrb[6].mxu1 }
 0x47a   : > { %862 = vst [vmem:[%s358_s19] sm:$0xff] %v856_v20  ;;  %v859_v23 = vadd.f32 %v1028_v2, %v858_v22  ;;  %v1158_v24 = vpop.f32.mrb[7].mxu1 }
 0x47c   : > { %863 = vst [vmem:[%s358_s19 + $0x8] sm:$0xff] %v859_v23 }
 0x47d   : > { %1409 = shalt.err (!%p1406_p0)
}
 0x47e   : > { %s1410_s14 = scalar_lea.hbm %s1779_s20, 256  ;;  %s1414_s13 = scalar_lea.hbm %s1830_s8, 512 }
 0x47f   : > { %p1411_p10 = scmp.ne.s32.totalorder %s1779_s20, %s1410_s14  ;;  %p1415_p4 = scmp.lt.u32.totalorder %s1779_s20, %s1830_s8 }
 0x480   : > { %p1416_p12 = scmp.lt.u32.totalorder %s1414_s13, %s1410_s14  ;;  %p1418_p8 = scmp.lt.u32.totalorder %s1410_s14, %s1779_s20 }
 0x481   : > { %p1412_p2 = pnand %p1411_p10, %p1854_p11 }
 0x482   : > { %p1417_p7 = por %p1416_p12, %p1415_p4 }
 0x483   : > { %p1413_p3 = pneg %p1412_p2 }
 0x484   : > { %p1419_p13 = por %p1418_p8, %p1417_p7 }
 0x486   : > { %p1420_p1 = pnand %p1419_p13, %p1413_p3 }
 0x488   : > { %1423 = shalt.err (!%p1420_p1)
}
 0x489   : > { %s1484_s25 = smov 128   ;;  %s1485_s19 = smov 8  }
 0x48a   : > { %1175 = dma.vmem_to_hbm [thread:$0]  (%p1854_p11), %s1774_s24, 256, %s1779_s20, %s1781_s18, %s1484_s25, %s1484_s25, %s1485_s19  }
 0x48b PF: > { %s1855_s22 = sld [smem:[#allocation18_spill]]  ;;  %p1202_p6 = scmp.ge.s32.totalorder %s1470_s30, 2 }
 0x48c   : > { %s893_s29 = sand.u32 1, %s1458_s27  }
 0x48d   : > { %s894_s17 = scalar_lea.sflag [#allocation4], %s893_s29 }
 0x491   : > { %p1856_p9 = scmp.ne.s32.totalorder %s1855_s22, 0 }
 0x493   : > { %p1191_p5 = pnand %p1202_p6, %p1856_p9 }
 0x495   : > { %1453 = dma.done.wait (!%p1191_p5), %s894_s17, 256  }
 0x496   : > { %1455 = vsyncadd (!%p1191_p5), %s894_s17, 4294967040  ;;  %s1857_s30 = sld [smem:[#allocation16_spill]]  ;;  %s1858_s9 = sld [smem:[#allocation15_spill]] }
 0x497   : > { %s1859_s29 = sld [smem:[#allocation17_spill]]  ;;  %s1860_s27 = smov %s1462_s28 }
 0x49c   : > { %p21_p0 = scmp.ge.s32.totalorder %s1857_s30, 4   ;;  %s1861_s28 = smov %s1858_s9 }
 0x49e   :  { %23 = sbr.rel (!%p21_p0) target bundleno = 6 (0x6), region = 104 }
 0x4a5   :  { %899 = vsyncpa [#allocation3], 1 }
 0x4a6   :  { %901 = vsyncpa [#allocation3 + $0x1], 1 }
 0x4a7   :  { %902 = vsyncpa [#allocation6], 1 }
 0x4a8   :  { %903 = vsyncpa [#allocation9], 1 }
 0x4a9   :  { %904 = vsyncpa [#allocation4], 1 }
 0x4aa   :  { %906 = vsyncpa [#allocation4 + $0x1], 1 }

</bundles_post_ra>
